<compile_context>
chip_gen: v6e
topology: v6e:2x2x1
jax: 0.10.0
libtpu: 0.0.40
codegen_flags: <defaults>
</compile_context>

<pallas_src>
import functools

import jax
import jax.numpy as jnp
from jax.experimental import pallas as pl
from jax.experimental.pallas import tpu as pltpu


def _round_up(x, m):
    return ((x + m - 1) // m) * m


def _ffn_kernel(x_ref, w_in_ref, b_in_ref, w_out_ref, b_out_ref, o_ref):
    """Fused Linear -> GELU(exact) -> Linear on one lane-dense row tile."""
    # First linear on the MXU: native-dtype operands, f32 accumulation.
    h = jnp.dot(x_ref[...], w_in_ref[...], preferred_element_type=jnp.float32)
    h = h + b_in_ref[...].astype(jnp.float32)

    # Exact GELU: 0.5 * x * (1 + erf(x / sqrt(2)))  (matches torch.nn.GELU()).
    h = 0.5 * h * (1.0 + jax.lax.erf(h * jnp.float32(0.7071067811865476)))

    # Second linear; cast the f32 activation to the weight dtype so bf16
    # weights run at full MXU rate (no-op when weights are f32).
    out = jnp.dot(h.astype(w_out_ref.dtype), w_out_ref[...],
                  preferred_element_type=jnp.float32)
    out = out + b_out_ref[...].astype(jnp.float32)

    o_ref[...] = out.astype(o_ref.dtype)


@functools.partial(jax.jit, static_argnames=("tile_m",))
def position_wise_feed_forward(h_V, w_in, b_in, w_out, b_out, *, tile_m=1024):
    """h_V: [..., H]; w_in: [H, F]; b_in: [F]; w_out: [F, H]; b_out: [H].

    Weights are stored pre-transposed relative to torch's [out, in] layout.
    """
    orig_shape = h_V.shape
    H = orig_shape[-1]
    F = w_in.shape[1]

    x2d = h_V.reshape(-1, H)
    M = x2d.shape[0]

    # ---- Lane-dense layout: pad H / F up to multiples of 128 (zero pad). ----
    # Zero columns/rows contribute exact zeros to the contractions, so the
    # result is bit-identical; padded output columns are sliced off below.
    # This is a no-op (no copies) when H and F are already 128-aligned.
    Hp = _round_up(H, 128)
    Fp = _round_up(F, 128)
    if Hp != H:
        x2d = jnp.pad(x2d, ((0, 0), (0, Hp - H)))
    w_in_p = (jnp.pad(w_in, ((0, Hp - H), (0, Fp - F)))
              if (Hp != H or Fp != F) else w_in)
    w_out_p = (jnp.pad(w_out, ((0, Fp - F), (0, Hp - H)))
               if (Hp != H or Fp != F) else w_out)
    b_in_p = (jnp.pad(b_in, (0, Fp - F)) if Fp != F else b_in).reshape(1, Fp)
    b_out_p = (jnp.pad(b_out, (0, Hp - H)) if Hp != H else b_out).reshape(1, Hp)

    x_it = x2d.dtype.itemsize
    o_it = h_V.dtype.itemsize
    w_it = w_in.dtype.itemsize

    # ---- Choose the token tile: as large as VMEM allows, balanced grid. ----
    def vmem_est(tm):
        act = 2 * tm * Hp * (x_it + o_it)        # double-buffered x / out tiles
        wts = 2 * (Hp * Fp + Fp * Hp) * w_it     # double-buffered resident weights
        mid = 3 * tm * Fp * 4                    # f32 intermediate + epilogue temps
        return act + wts + mid

    budget = 24 * 1024 * 1024
    tm = max(8, (int(tile_m) // 8) * 8)
    while tm > 8 and vmem_est(tm) > budget:
        tm = max(8, tm // 2)
    # TODO(synk): if the two weight slabs alone exceed VMEM (very large H*F,
    # e.g. on v7x's 64 MiB), tile the F axis with a grid reduction instead of
    # keeping both weights fully resident.

    if M <= tm:
        # Small problem: try two balanced programs so v7x megacore can shard
        # the token axis; otherwise one full-array block (valid for any M).
        half = _round_up((M + 1) // 2, 8)
        tm = half if 8 <= half < M else M
    else:
        # Re-balance block sizes across the grid (avoid giant block + tiny tail).
        n_blk = -(-M // tm)
        tm = min(tm, _round_up(-(-M // n_blk), 8))

    grid = (-(-M // tm),)   # ragged last block is clipped by Pallas (row-wise op)

    # ---- Compiler params / cost estimate. ----
    ckw = {"dimension_semantics": ("parallel",)}
    need = vmem_est(tm)
    if need > 12 * 1024 * 1024:   # raise above the default scoped limit only if needed
        ckw["vmem_limit_bytes"] = int(min(max(need * 13 // 10, 16 * 2**20), 64 * 2**20))

    cost = pl.CostEstimate(
        flops=int(4 * M * Hp * Fp),
        transcendentals=int(M * Fp),
        bytes_accessed=int(M * Hp * (x_it + o_it)
                           + (Hp * Fp + Fp * Hp) * w_it
                           + (Fp + Hp) * w_it),
    )

    out2d = pl.pallas_call(
        _ffn_kernel,
        out_shape=jax.ShapeDtypeStruct((M, Hp), h_V.dtype),
        grid_spec=pltpu.PrefetchScalarGridSpec(
            num_scalar_prefetch=0,
            grid=grid,
            in_specs=[
                pl.BlockSpec((tm, Hp), lambda i: (i, 0)),   # x row tile (lane-dense)
                pl.BlockSpec((Hp, Fp), lambda i: (0, 0)),   # W_in (VMEM-resident)
                pl.BlockSpec((1, Fp), lambda i: (0, 0)),    # b_in
                pl.BlockSpec((Fp, Hp), lambda i: (0, 0)),   # W_out (VMEM-resident)
                pl.BlockSpec((1, Hp), lambda i: (0, 0)),    # b_out
            ],
            out_specs=pl.BlockSpec((tm, Hp), lambda i: (i, 0)),
        ),
        compiler_params=pltpu.CompilerParams(**ckw),
        cost_estimate=cost,
    )(x2d, w_in_p, b_in_p, w_out_p, b_out_p)

    if Hp != H:
        out2d = out2d[:, :H]
    return out2d.reshape(orig_shape)


def _ref_forward(h_V, w_in, b_in, w_out, b_out):
    """Pure-JAX reference matching the PyTorch module exactly."""
    h = jnp.dot(h_V, w_in) + b_in
    h = jax.nn.gelu(h, approximate=False)   # torch.nn.GELU() default = exact
    return jnp.dot(h, w_out) + b_out


if __name__ == "__main__":
    num_hidden = 32
    num_ff = 64
    batch, seq = 2, 8          # h_V: (batch, seq, num_hidden)

    key = jax.random.PRNGKey(0)
    k_x, k_wi, k_bi, k_wo, k_bo = jax.random.split(key, 5)

    # Deterministic PyTorch-style init: U(-1/sqrt(fan_in), 1/sqrt(fan_in)).
    lim_in = 1.0 / jnp.sqrt(jnp.float32(num_hidden))
    lim_out = 1.0 / jnp.sqrt(jnp.float32(num_ff))
    # Stored pre-transposed relative to torch's [out, in] convention.
    w_in = jax.random.uniform(k_wi, (num_hidden, num_ff), jnp.float32,
                              -lim_in, lim_in)
    b_in = jax.random.uniform(k_bi, (num_ff,), jnp.float32, -lim_in, lim_in)
    w_out = jax.random.uniform(k_wo, (num_ff, num_hidden), jnp.float32,
                               -lim_out, lim_out)
    b_out = jax.random.uniform(k_bo, (num_hidden,), jnp.float32,
                               -lim_out, lim_out)

    h_V = jax.random.normal(k_x, (batch, seq, num_hidden), jnp.float32)

    out = position_wise_feed_forward(h_V, w_in, b_in, w_out, b_out)
    out = jax.block_until_ready(out)

    ref = _ref_forward(h_V, w_in, b_in, w_out, b_out)
    assert out.shape == h_V.shape
    assert jnp.allclose(out, ref, atol=1e-5, rtol=1e-5), "mismatch vs reference"

    print("KERNEL_OK")
</pallas_src>

<mosaic_0001>
module attributes {stable_mosaic.version = 11 : i64} {
  func.func @_ffn_kernel(%arg0: i32, %arg1: memref<8x128xf32, #tpu.memory_space<vmem>>, %arg2: memref<128x128xf32, #tpu.memory_space<vmem>>, %arg3: memref<1x128xf32, #tpu.memory_space<vmem>>, %arg4: memref<128x128xf32, #tpu.memory_space<vmem>>, %arg5: memref<1x128xf32, #tpu.memory_space<vmem>>, %arg6: memref<8x128xf32, #tpu.memory_space<vmem>>) attributes {dimension_semantics = [#tpu.dimension_semantics<parallel>], iteration_bounds = array<i64: 2>, scalar_prefetch = 0 : i64, scratch_operands = 0 : i64, tpu.core_type = #tpu.core_type<tc>, window_params = [{transform_indices = @transform_0, window_bounds = array<i64: 8, 128>}, {pipeline_mode = #tpu.pipeline_mode<synchronous>, transform_indices = @transform_1, window_bounds = array<i64: 128, 128>}, {pipeline_mode = #tpu.pipeline_mode<synchronous>, transform_indices = @transform_2, window_bounds = array<i64: 1, 128>}, {pipeline_mode = #tpu.pipeline_mode<synchronous>, transform_indices = @transform_3, window_bounds = array<i64: 128, 128>}, {pipeline_mode = #tpu.pipeline_mode<synchronous>, transform_indices = @transform_4, window_bounds = array<i64: 1, 128>}, {transform_indices = @transform_5, window_bounds = array<i64: 8, 128>}]} {
    %c0 = arith.constant 0 : index
    %c0_0 = arith.constant 0 : index
    %0 = vector.load %arg1[%c0, %c0_0] : memref<8x128xf32, #tpu.memory_space<vmem>>, vector<8x128xf32>
    %c0_1 = arith.constant 0 : index
    %c0_2 = arith.constant 0 : index
    %1 = vector.load %arg2[%c0_1, %c0_2] : memref<128x128xf32, #tpu.memory_space<vmem>>, vector<128x128xf32>
    %cst = arith.constant dense<0.000000e+00> : vector<8x128xf32>
    %2 = tpu.matmul %0, %1, %cst {dimension_numbers = #tpu.dot_dimension_numbers<[1], [0], [0], [1], [0, 0, 1, 1], [], []>} : vector<8x128xf32>, vector<128x128xf32>, vector<8x128xf32> -> vector<8x128xf32>
    %c0_3 = arith.constant 0 : index
    %c0_4 = arith.constant 0 : index
    %3 = vector.load %arg3[%c0_3, %c0_4] : memref<1x128xf32, #tpu.memory_space<vmem>>, vector<1x128xf32>
    %4 = vector.broadcast %3 : vector<1x128xf32> to vector<8x128xf32>
    %5 = arith.addf %2, %4 : vector<8x128xf32>
    %cst_5 = arith.constant 5.000000e-01 : f32
    %6 = vector.broadcast %cst_5 : f32 to vector<8x128xf32>
    %7 = arith.mulf %6, %5 : vector<8x128xf32>
    %cst_6 = arith.constant 0.707106769 : f32
    %8 = vector.broadcast %cst_6 : f32 to vector<8x128xf32>
    %9 = arith.mulf %5, %8 : vector<8x128xf32>
    %10 = math.erf %9 : vector<8x128xf32>
    %cst_7 = arith.constant 1.000000e+00 : f32
    %11 = vector.broadcast %cst_7 : f32 to vector<8x128xf32>
    %12 = arith.addf %11, %10 : vector<8x128xf32>
    %13 = arith.mulf %7, %12 : vector<8x128xf32>
    %c0_8 = arith.constant 0 : index
    %c0_9 = arith.constant 0 : index
    %14 = vector.load %arg4[%c0_8, %c0_9] : memref<128x128xf32, #tpu.memory_space<vmem>>, vector<128x128xf32>
    %cst_10 = arith.constant dense<0.000000e+00> : vector<8x128xf32>
    %15 = tpu.matmul %13, %14, %cst_10 {dimension_numbers = #tpu.dot_dimension_numbers<[1], [0], [0], [1], [0, 0, 1, 1], [], []>} : vector<8x128xf32>, vector<128x128xf32>, vector<8x128xf32> -> vector<8x128xf32>
    %c0_11 = arith.constant 0 : index
    %c0_12 = arith.constant 0 : index
    %16 = vector.load %arg5[%c0_11, %c0_12] : memref<1x128xf32, #tpu.memory_space<vmem>>, vector<1x128xf32>
    %17 = vector.broadcast %16 : vector<1x128xf32> to vector<8x128xf32>
    %18 = arith.addf %15, %17 : vector<8x128xf32>
    %c0_13 = arith.constant 0 : index
    %c0_14 = arith.constant 0 : index
    %19 = vector.load %arg6[%c0_13, %c0_14] : memref<8x128xf32, #tpu.memory_space<vmem>>, vector<8x128xf32>
    tpu.vector_store %arg6[%c0_13, %c0_14], %18 {strides = array<i32>} : memref<8x128xf32, #tpu.memory_space<vmem>>, vector<8x128xf32>,
    return
  }
  func.func @transform_0(%arg0: i32) -> (i32, i32) {
    %c0_i32 = arith.constant 0 : i32
    %c0_i32_0 = arith.constant 0 : i32
    return %arg0, %c0_i32 : i32, i32
  }
  func.func @transform_1(%arg0: i32) -> (i32, i32) {
    %c0_i32 = arith.constant 0 : i32
    %c0_i32_0 = arith.constant 0 : i32
    %c0_i32_1 = arith.constant 0 : i32
    return %c0_i32, %c0_i32_0 : i32, i32
  }
  func.func @transform_2(%arg0: i32) -> (i32, i32) {
    %c0_i32 = arith.constant 0 : i32
    %c0_i32_0 = arith.constant 0 : i32
    %c0_i32_1 = arith.constant 0 : i32
    return %c0_i32, %c0_i32_0 : i32, i32
  }
  func.func @transform_3(%arg0: i32) -> (i32, i32) {
    %c0_i32 = arith.constant 0 : i32
    %c0_i32_0 = arith.constant 0 : i32
    %c0_i32_1 = arith.constant 0 : i32
    return %c0_i32, %c0_i32_0 : i32, i32
  }
  func.func @transform_4(%arg0: i32) -> (i32, i32) {
    %c0_i32 = arith.constant 0 : i32
    %c0_i32_0 = arith.constant 0 : i32
    %c0_i32_1 = arith.constant 0 : i32
    return %c0_i32, %c0_i32_0 : i32, i32
  }
  func.func @transform_5(%arg0: i32) -> (i32, i32) {
    %c0_i32 = arith.constant 0 : i32
    %c0_i32_0 = arith.constant 0 : i32
    return %arg0, %c0_i32 : i32, i32
  }
}

</mosaic_0001>

<bundles_post_ra>
// kernel: position_wise_feed_forward.1
= control target key start
LH: loop header
LB: loop body
LE: loop exit
PB: predicated region body
PF: predicated region fallthrough
CT: control target
= control target key end

     0   :  { %s633_s18 = smov 0   ;;  %s797_s0 = inlined_call_operand.vmem [shape: f32[16,128], index: 0, kind: input, shape index: {}]   ;;  %s798_s1 = inlined_call_operand.vmem [shape: f32[128,128], index: 1, kind: input, shape index: {}]   ;;  %s799_s2 = inlined_call_operand.vmem [shape: f32[1,128], index: 2, kind: input, shape index: {}]   ;;  %s800_s3 = inlined_call_operand.vmem [shape: f32[128,128], index: 3, kind: input, shape index: {}]   ;;  %s801_s4 = inlined_call_operand.vmem [shape: f32[1,128], index: 4, kind: input, shape index: {}]   ;;  %s802_s5 = inlined_call_operand.vmem [shape: f32[16,128], index: 5, kind: output, shape index: {}]  }
   0x1 LB: > { %s466_s19 = sadd.s32 4294967295, %s599_s18   ;;  %p470_p0 = scmp.ge.s32.totalorder %s599_s18, 1  ;;  %s599_s18 = sphi %s633_s18, %s15_s18  }
   0x2   : > { %p186_p1 = scmp.lt.s32.totalorder %s599_s18, 3 }
   0x4   : > { %p187_p2 = pnand %p470_p0, %p186_p1 }
   0x5   : > { %p212_p3 = scmp.lt.s32.totalorder (!%p187_p2), %s466_s19, 1 }
   0x6   : > { %190 = sbr.rel (%p187_p2) target bundleno = 455 (0x1c7), region = 40 }
   0xb   : > { %v236_v0 = vld [vmem:[%s798_s1 + $0x78] sm:$0xff]  ;;  %v601_v1 = vmov 0.0   ;;  %v235_v2 = vld [vmem:[%s798_s1 + $0x70] sm:$0xff]  ;;  %vm602_vm0 = vmmov 0   ;;  %v234_v3 = vld [vmem:[%s798_s1 + $0x68] sm:$0xff]  ;;  %s804_s19 = smov (!%p212_p3, %s466_s19), 1 }
   0xc   : > { %511 = vmatprep.subr.mxu0 %v601_v1  ;;  %543 = vmatprep.mubr.msk.f32.mxu0 %vm602_vm0, %v601_v1  ;;  %v233_v4 = vld [vmem:[%s798_s1 + $0x60] sm:$0xff]  ;;  %v334_v5 = vld [vmem:[%s800_s3 + $0x78] sm:$0xff]  ;;  %v333_v6 = vld [vmem:[%s800_s3 + $0x70] sm:$0xff]  ;;  %s471_s6 = sshll.u32 %s804_s19, 3 }
   0xd   : > { %512 = vmatpush3.msra.mxu0 %v236_v0  ;;  %546 = vmatprep.subr.mxu1 %v601_v1  ;;  %v232_v7 = vld [vmem:[%s798_s1 + $0x58] sm:$0xff]  ;;  %v332_v8 = vld [vmem:[%s800_s3 + $0x68] sm:$0xff]  ;;  %v231_v9 = vld [vmem:[%s798_s1 + $0x50] sm:$0xff]  ;;  %s215_s13 = scalar_lea.vmem %s797_s0, %s471_s6  ;;  %s219_s26 = scalar_lea.vmem %s802_s5, %s471_s6 }
   0xe   : > { %513 = vmatprep.subr.mxu0 %v601_v1  ;;  %578 = vmatprep.mubr.msk.f32.mxu1 %vm602_vm0, %v601_v1  ;;  %v331_v10 = vld [vmem:[%s800_s3 + $0x60] sm:$0xff]  ;;  %v230_v11 = vld [vmem:[%s798_s1 + $0x48] sm:$0xff]  ;;  %v228_v13 = vld [vmem:[%s798_s1 + $0x38] sm:$0xff] }
   0xf   : > { %514 = vmatpush3.msra.mxu0 %v235_v2  ;;  %547 = vmatpush3.msra.mxu1 %v334_v5  ;;  %v229_v12 = vld [vmem:[%s798_s1 + $0x40] sm:$0xff]  ;;  %v227_v14 = vld [vmem:[%s798_s1 + $0x30] sm:$0xff]  ;;  %v226_v15 = vld [vmem:[%s798_s1 + $0x28] sm:$0xff] }
  0x10   : > { %515 = vmatprep.subr.mxu0 %v601_v1  ;;  %548 = vmatprep.subr.mxu1 %v601_v1  ;;  %v225_v16 = vld [vmem:[%s798_s1 + $0x20] sm:$0xff]  ;;  %v224_v17 = vld [vmem:[%s798_s1 + $0x18] sm:$0xff]  ;;  %v223_v18 = vld [vmem:[%s798_s1 + $0x10] sm:$0xff] }
  0x11   : > { %516 = vmatpush3.msra.mxu0 %v234_v3  ;;  %549 = vmatpush3.msra.mxu1 %v333_v6  ;;  %v222_v19 = vld [vmem:[%s798_s1 + $0x8] sm:$0xff]  ;;  %v221_v20 = vld [vmem:[%s798_s1] sm:$0xff]  ;;  %v330_v22 = vld [vmem:[%s800_s3 + $0x58] sm:$0xff] }
  0x12   : > { %517 = vmatprep.subr.mxu0 %v601_v1  ;;  %550 = vmatprep.subr.mxu1 %v601_v1  ;;  %v220_v21 = vld [vmem:[%s215_s13] sm:$0xff]  ;;  %v329_v23 = vld [vmem:[%s800_s3 + $0x50] sm:$0xff]  ;;  %v328_v24 = vld [vmem:[%s800_s3 + $0x48] sm:$0xff] }
  0x13   : > { %518 = vmatpush3.msra.mxu0 %v233_v4  ;;  %551 = vmatpush3.msra.mxu1 %v332_v8  ;;  %v327_v25 = vld [vmem:[%s800_s3 + $0x40] sm:$0xff]  ;;  %v326_v26 = vld [vmem:[%s800_s3 + $0x38] sm:$0xff]  ;;  %v325_v27 = vld [vmem:[%s800_s3 + $0x30] sm:$0xff] }
  0x14   : > { %519 = vmatprep.subr.mxu0 %v601_v1  ;;  %552 = vmatprep.subr.mxu1 %v601_v1  ;;  %v324_v28 = vld [vmem:[%s800_s3 + $0x28] sm:$0xff]  ;;  %v323_v29 = vld [vmem:[%s800_s3 + $0x20] sm:$0xff]  ;;  %v322_v30 = vld [vmem:[%s800_s3 + $0x18] sm:$0xff] }
  0x15   : > { %520 = vmatpush3.msra.mxu0 %v232_v7  ;;  %553 = vmatpush3.msra.mxu1 %v331_v10  ;;  %v321_v31 = vld [vmem:[%s800_s3 + $0x10] sm:$0xff]  ;;  %v320_v32 = vld [vmem:[%s800_s3 + $0x8] sm:$0xff]  ;;  %v319_v33 = vld [vmem:[%s800_s3] sm:$0xff] }
  0x16   : > { %521 = vmatprep.subr.mxu0 %v601_v1  ;;  %554 = vmatprep.subr.mxu1 %v601_v1  ;;  %v473_v34 = vld [vmem:[%s799_s2] ss:$0 sm:$0xff] }
  0x17   : > { %522 = vmatpush3.msra.mxu0 %v231_v9  ;;  %555 = vmatpush3.msra.mxu1 %v330_v22  ;;  %v474_v43 = vld [vmem:[%s801_s4] ss:$0 sm:$0xff] }
  0x18   : > { %523 = vmatprep.subr.mxu0 %v601_v1  ;;  %556 = vmatprep.subr.mxu1 %v601_v1 }
  0x19   : > { %524 = vmatpush3.msra.mxu0 %v230_v11  ;;  %557 = vmatpush3.msra.mxu1 %v329_v23 }
  0x1a   : > { %525 = vmatprep.subr.mxu0 %v601_v1  ;;  %558 = vmatprep.subr.mxu1 %v601_v1 }
  0x1b   : > { %526 = vmatpush3.msra.mxu0 %v229_v12  ;;  %559 = vmatpush3.msra.mxu1 %v328_v24 }
  0x1c   : > { %527 = vmatprep.subr.mxu0 %v601_v1  ;;  %560 = vmatprep.subr.mxu1 %v601_v1 }
  0x1d   : > { %528 = vmatpush3.msra.mxu0 %v228_v13  ;;  %561 = vmatpush3.msra.mxu1 %v327_v25 }
  0x1e   : > { %529 = vmatprep.subr.mxu0 %v601_v1  ;;  %562 = vmatprep.subr.mxu1 %v601_v1 }
  0x1f   : > { %530 = vmatpush3.msra.mxu0 %v227_v14  ;;  %563 = vmatpush3.msra.mxu1 %v326_v26 }
  0x20   : > { %531 = vmatprep.subr.mxu0 %v601_v1  ;;  %564 = vmatprep.subr.mxu1 %v601_v1 }
  0x21   : > { %532 = vmatpush3.msra.mxu0 %v226_v15  ;;  %565 = vmatpush3.msra.mxu1 %v325_v27 }
  0x22   : > { %533 = vmatprep.subr.mxu0 %v601_v1  ;;  %566 = vmatprep.subr.mxu1 %v601_v1 }
  0x23   : > { %534 = vmatpush3.msra.mxu0 %v225_v16  ;;  %567 = vmatpush3.msra.mxu1 %v324_v28 }
  0x24   : > { %535 = vmatprep.subr.mxu0 %v601_v1  ;;  %568 = vmatprep.subr.mxu1 %v601_v1 }
  0x25   : > { %536 = vmatpush3.msra.mxu0 %v224_v17  ;;  %569 = vmatpush3.msra.mxu1 %v323_v29 }
  0x26   : > { %537 = vmatprep.subr.mxu0 %v601_v1  ;;  %570 = vmatprep.subr.mxu1 %v601_v1 }
  0x27   : > { %538 = vmatpush3.msra.mxu0 %v223_v18  ;;  %571 = vmatpush3.msra.mxu1 %v322_v30 }
  0x28   : > { %539 = vmatprep.subr.mxu0 %v601_v1  ;;  %572 = vmatprep.subr.mxu1 %v601_v1 }
  0x29   : > { %540 = vmatpush3.msra.mxu0 %v222_v19  ;;  %573 = vmatpush3.msra.mxu1 %v321_v31 }
  0x2a   : > { %541 = vmatprep.subr.mxu0 %v601_v1  ;;  %574 = vmatprep.subr.mxu1 %v601_v1 }
  0x2b   : > { %542 = vmatpush3.msra.mxu0 %v221_v20  ;;  %575 = vmatpush3.msra.mxu1 %v320_v32 }
  0x2c   : > { %544 = vmatmul.mubr.f32.vlgmr.msra.gmra.mxu0 %v220_v21  ;;  %576 = vmatprep.subr.mxu1 %v601_v1 }
  0x2d   : > { %577 = vmatpush3.msra.mxu1 %v319_v33 }
  0xec   : > { %v310_v35 = vpop.f32.mrf.mxu0 }
  0xed   : > { %v311_v36 = vadd.f32 %v473_v34, %v310_v35 }
  0xee   : > { %v545_v37 = vpop.f32.mrf.mxu0 }
  0xef   : > { %v315_v38 = vmul.f32 0.70710677, %v311_v36  ;;  %v314_v40 = vmul.f32 0.5, %v311_v36 }
  0xf1   : > { %591 = verf.f32 %v315_v38 }
  0xfe   : > { %v592_v39 = vpop.eup %591 }
  0xff   : > { %v317_v41 = vadd.f32 1.0, %v592_v39 }
 0x101   : > { %v318_v42 = vmul.f32 %v317_v41, %v314_v40 }
 0x103   : > { %579 = vmatmul.mubr.f32.vlgmr.msra.gmra.mxu1 %v318_v42 }
 0x1c3   : > { %v408_v44 = vpop.f32.mrf.mxu1 }
 0x1c4   : > { %v409_v45 = vadd.f32 %v474_v43, %v408_v44 }
 0x1c5   : > { %v580_v46 = vpop.f32.mrf.mxu1 }
 0x1c6   : > { %412 = vst [vmem:[%s219_s26] sm:$0xff] %v409_v45 }
 0x1c7 PF: > { %s15_s18 = sadd.s32 1, %s599_s18  }
 0x1c8   : > { %p12_p4 = scmp.ge.s32.totalorder %s15_s18, 4  }
 0x1ca   :  { %14 = sbr.rel (!%p12_p4) target bundleno = 1 (0x1), region = 70 }

</bundles_post_ra>
